<compile_context>
chip_gen: v6e
topology: v6e:2x2x1
jax: 0.10.0
libtpu: 0.0.40
codegen_flags: <defaults>
</compile_context>

<pallas_src>
import jax
import jax.numpy as jnp
from jax.experimental import pallas as pl
from jax.experimental.pallas import tpu as pltpu


_NEG_LARGE = -1e30  # finite "minus infinity": fully-masked rows can't produce NaN


def _make_kernel(use_mask: bool, use_shift_row: bool, write_attn: bool):
    def kernel(*refs):
        i = 0
        q_ref = refs[i]; i += 1
        k_ref = refs[i]; i += 1
        v_ref = refs[i]; i += 1
        mask_ref = None
        row_ref = None
        if use_mask:
            mask_ref = refs[i]; i += 1
        if use_shift_row:
            row_ref = refs[i]; i += 1
        out_ref = refs[i]; i += 1
        attn_ref = refs[i] if write_attn else None

        q = q_ref[0, 0]          # (TQ, D), native dtype
        k = k_ref[0, 0]          # (S,  D), pre-rolled + pre-scaled in the wrapper
        v = v_ref[0, 0]          # (S,  D)

        # q @ k^T with the contraction on D (no transpose/relayout of the K tile).
        scores = jax.lax.dot_general(
            q, k, dimension_numbers=(((1,), (1,)), ((), ())),
            preferred_element_type=jnp.float32)                    # (TQ, S) f32

        if use_mask:
            # int8 keep-mask (1 = keep, 0 = masked), already rolled by `shift` and with
            # the first-`shift`-columns fill folded in by the wrapper.
            mvals = mask_ref[0, 0].astype(jnp.float32)
            scores = jnp.where(mvals == 0.0, jnp.float32(_NEG_LARGE), scores)

        if use_shift_row:
            # No-mask shift: tiny (1, S) additive row (-1e30 on the first `shift` cols),
            # broadcast over TQ — no per-step iota/compare/select pass.
            scores = scores + row_ref[0, 0]

        # Numerically-stable softmax along K.
        row_max = jnp.max(scores, axis=-1, keepdims=True)
        p = jnp.exp(scores - row_max)
        denom = jnp.sum(p, axis=-1, keepdims=True)
        attn = p * pl.reciprocal(denom, approx=True)               # EUP, not VPU divide

        attn_lo = attn.astype(v_ref.dtype)                         # single low-prec cast
        if write_attn:
            if attn_ref.dtype == v_ref.dtype:
                attn_ref[0, 0] = attn_lo                           # reuse, no second cast
            else:
                attn_ref[0, 0] = attn.astype(attn_ref.dtype)
        out_ref[0, 0] = jnp.dot(attn_lo, v,
                                preferred_element_type=jnp.float32).astype(out_ref.dtype)

    return kernel


def _vmem_capacity_bytes() -> int:
    try:
        return int(pltpu.get_tpu_info().vmem_capacity_bytes)
    except Exception:
        return 64 * 1024 * 1024   # conservative fallback (v7x per-TensorCore VMEM)


def _vmem_estimate_bytes(tq, S, D, q_bytes, kv_bytes, mask_bytes, attn_bytes) -> int:
    est = 0
    est += 2 * 2 * S * D * kv_bytes      # K and V full blocks, double-buffered
    est += 2 * tq * D * q_bytes          # q tile
    est += 2 * tq * D * q_bytes          # out tile
    est += 2 * tq * S * mask_bytes       # int8 mask tile (0 if unused)
    est += 2 * tq * S * attn_bytes       # attn-weights tile (0 if not materialized)
    est += 4 * tq * S * 4                # f32 scores / exp / attn temporaries + headroom
    return est


def _pick_q_tile(S, D, q_bytes, kv_bytes, mask_bytes, attn_bytes, budget) -> int:
    # Largest 8-aligned divisor of S (capped at 512) whose working set fits the budget.
    cands = [t for t in range(8, min(S, 512) + 1, 8) if S % t == 0]
    if not cands:
        return S                          # tiny / odd S: single full-extent block
    for tq in sorted(cands, reverse=True):
        if _vmem_estimate_bytes(tq, S, D, q_bytes, kv_bytes, mask_bytes, attn_bytes) <= budget:
            return tq
    return cands[0]                       # smallest aligned divisor


def shift_attention(query, keys, vals, mask=None, *, shift=0, training=False,
                    return_attention=True, attention_dtype=None):
    """ShiftAttention eval-mode forward.

    Returns (output, attention_weight) if return_attention else output.
    attention_dtype=jnp.bfloat16 halves the (B,H,S,S) writeback if the caller tolerates it.
    """
    B, H, S, D = query.shape
    eff_shift = int(shift) if (not training and int(shift) > 0) else 0
    if eff_shift >= S:
        raise ValueError(f"shift ({shift}) must be < seq_len ({S})")

    use_mask = mask is not None
    use_shift_row = (eff_shift > 0) and not use_mask
    attn_dtype = jnp.dtype(query.dtype if attention_dtype is None else attention_dtype)

    # Fold the score roll into K: roll(q@k^T, shift, -1)[:, j] == q . k[j-shift];
    # fold the 1/sqrt(d) scale into the same wrapper pass over K.
    scale = float(D) ** -0.5
    keys_used = jnp.roll(keys, eff_shift, axis=2) if eff_shift > 0 else keys
    keys_used = (keys_used * scale).astype(keys.dtype)

    q_bytes = jnp.dtype(query.dtype).itemsize
    kv_bytes = jnp.dtype(keys.dtype).itemsize
    mask_bytes = 1 if use_mask else 0
    attn_bytes = attn_dtype.itemsize if return_attention else 0

    vmem_budget = _vmem_capacity_bytes() * 3 // 4
    tq = _pick_q_tile(S, D, q_bytes, kv_bytes, mask_bytes, attn_bytes, vmem_budget)
    nq = S // tq

    q_spec = pl.BlockSpec((1, 1, tq, D), lambda b, h, qi: (b, h, qi, 0))
    kv_spec = pl.BlockSpec((1, 1, S, D), lambda b, h, qi: (b, h, 0, 0))
    out_spec = pl.BlockSpec((1, 1, tq, D), lambda b, h, qi: (b, h, qi, 0))

    operands = [query, keys_used, vals]
    in_specs = [q_spec, kv_spec, kv_spec]

    if use_mask:
        m = jnp.asarray(mask)
        if m.ndim > 4:
            raise ValueError("mask must have at most 4 dims")
        m = m.reshape((1,) * (4 - m.ndim) + m.shape)
        # Broadcast only the (query, key) dims; leading dims stay de-duplicated
        # (never materialize a (B,H,S,S) mask for a broadcastable input).
        m = jnp.broadcast_to(m, m.shape[:2] + (S, S))
        m_i8 = (m != 0).astype(jnp.int8)           # 1 = keep, 0 = masked
        if eff_shift > 0:
            m_i8 = jnp.roll(m_i8, eff_shift, axis=-1)
            m_i8 = m_i8.at[..., :eff_shift].set(0)  # shift column fill folded into mask
        bm, hm = int(m_i8.shape[0]), int(m_i8.shape[1])
        mask_spec = pl.BlockSpec(
            (1, 1, tq, S),
            lambda b, h, qi: (b if bm > 1 else 0, h if hm > 1 else 0, qi, 0))
        in_specs.append(mask_spec)
        operands.append(m_i8)

    if use_shift_row:
        col = jnp.arange(S, dtype=jnp.int32)
        shift_row = jnp.where(col < eff_shift, jnp.float32(_NEG_LARGE),
                              jnp.float32(0.0)).reshape(1, 1, 1, S)
        row_spec = pl.BlockSpec((1, 1, 1, S), lambda b, h, qi: (0, 0, 0, 0))
        in_specs.append(row_spec)
        operands.append(shift_row)

    kernel = _make_kernel(use_mask=use_mask, use_shift_row=use_shift_row,
                          write_attn=return_attention)

    if return_attention:
        out_shape = (jax.ShapeDtypeStruct((B, H, S, D), query.dtype),
                     jax.ShapeDtypeStruct((B, H, S, S), attn_dtype))
        out_specs = [out_spec,
                     pl.BlockSpec((1, 1, tq, S), lambda b, h, qi: (b, h, qi, 0))]
    else:
        out_shape = jax.ShapeDtypeStruct((B, H, S, D), query.dtype)
        out_specs = out_spec

    result = pl.pallas_call(
        kernel,
        out_shape=out_shape,
        grid_spec=pltpu.PrefetchScalarGridSpec(
            num_scalar_prefetch=0,
            grid=(B, H, nq),
            in_specs=in_specs,
            out_specs=out_specs),
        compiler_params=pltpu.CompilerParams(
            # Every grid axis writes a disjoint output block -> fully megacore-shardable.
            dimension_semantics=("parallel", "parallel", "parallel"),
            vmem_limit_bytes=int(vmem_budget)),
    )(*operands)

    # Dropout is identity in eval mode.
    return result


def _reference(query, keys, vals, mask, shift):
    d = query.shape[-1]
    s = jnp.einsum('bhqd,bhkd->bhqk', query, keys) / (d ** 0.5)
    if mask is not None:
        s = jnp.where(mask == 0, -jnp.inf, s)
    if shift > 0:
        s = jnp.roll(s, shift, axis=-1)
        s = s.at[..., :shift].set(-jnp.inf)
    attn = jax.nn.softmax(s, axis=-1)
    return jnp.einsum('bhqk,bhkd->bhqd', attn, vals), attn


if __name__ == "__main__":
    B, H, S, D = 2, 2, 8, 32
    shift = 2

    key = jax.random.PRNGKey(0)
    kq, kk, kv = jax.random.split(key, 3)
    q = jax.random.normal(kq, (B, H, S, D), dtype=jnp.float32)
    k = jax.random.normal(kk, (B, H, S, D), dtype=jnp.float32)
    v = jax.random.normal(kv, (B, H, S, D), dtype=jnp.float32)

    # Broadcastable (1, 1, S, S) causal mask (stays de-duplicated across B, H).
    causal = jnp.tril(jnp.ones((S, S), dtype=jnp.float32))[None, None]

    # Case 1: mask + shift.
    out, attn = shift_attention(q, k, v, causal, shift=shift)
    out, attn = jax.block_until_ready(out), jax.block_until_ready(attn)
    out_r, attn_r = _reference(q, k, v, causal, shift)
    assert jnp.allclose(out, out_r, atol=2e-3, rtol=2e-3), "output mismatch (mask+shift)"
    assert jnp.allclose(attn, attn_r, atol=2e-3, rtol=2e-3), "attn mismatch (mask+shift)"

    # Case 2: no mask + shift (tiny additive row; zero S^2 mask DMA).
    out2, attn2 = shift_attention(q, k, v, None, shift=shift)
    out2, attn2 = jax.block_until_ready(out2), jax.block_until_ready(attn2)
    out2_r, attn2_r = _reference(q, k, v, None, shift)
    assert jnp.allclose(out2, out2_r, atol=2e-3, rtol=2e-3), "output mismatch (shift)"
    assert jnp.allclose(attn2, attn2_r, atol=2e-3, rtol=2e-3), "attn mismatch (shift)"

    # Case 3: no mask, no shift.
    out3, attn3 = shift_attention(q, k, v, None, shift=0)
    out3, attn3 = jax.block_until_ready(out3), jax.block_until_ready(attn3)
    out3_r, attn3_r = _reference(q, k, v, None, 0)
    assert jnp.allclose(out3, out3_r, atol=2e-3, rtol=2e-3), "output mismatch (plain)"
    assert jnp.allclose(attn3, attn3_r, atol=2e-3, rtol=2e-3), "attn mismatch (plain)"

    # Case 4: skip materializing the (B,H,S,S) attention weights (roofline dominator).
    out4 = shift_attention(q, k, v, causal, shift=shift, return_attention=False)
    out4 = jax.block_until_ready(out4)
    assert jnp.allclose(out4, out_r, atol=2e-3, rtol=2e-3), "output mismatch (no attn out)"

    print("KERNEL_OK")
</pallas_src>

<mosaic_0001>
module attributes {stable_mosaic.version = 11 : i64} {
  func.func @kernel(%arg0: i32, %arg1: i32, %arg2: i32, %arg3: memref<1x1x8x32xf32, #tpu.memory_space<vmem>>, %arg4: memref<1x1x8x32xf32, #tpu.memory_space<vmem>>, %arg5: memref<1x1x8x32xf32, #tpu.memory_space<vmem>>, %arg6: memref<1x1x8x8xi8, #tpu.memory_space<vmem>>, %arg7: memref<1x1x8x32xf32, #tpu.memory_space<vmem>>, %arg8: memref<1x1x8x8xf32, #tpu.memory_space<vmem>>) attributes {dimension_semantics = [#tpu.dimension_semantics<parallel>, #tpu.dimension_semantics<parallel>, #tpu.dimension_semantics<parallel>], iteration_bounds = array<i64: 2, 2, 1>, scalar_prefetch = 0 : i64, scratch_operands = 0 : i64, tpu.core_type = #tpu.core_type<tc>, window_params = [{transform_indices = @transform_0, window_bounds = array<i64: 1, 1, 8, 32>}, {transform_indices = @transform_1, window_bounds = array<i64: 1, 1, 8, 32>}, {transform_indices = @transform_2, window_bounds = array<i64: 1, 1, 8, 32>}, {transform_indices = @transform_3, window_bounds = array<i64: 1, 1, 8, 8>}, {transform_indices = @transform_4, window_bounds = array<i64: 1, 1, 8, 32>}, {transform_indices = @transform_5, window_bounds = array<i64: 1, 1, 8, 8>}]} {
    %c0 = arith.constant 0 : index
    %c0_0 = arith.constant 0 : index
    %c0_1 = arith.constant 0 : index
    %c0_2 = arith.constant 0 : index
    %0 = vector.load %arg3[%c0, %c0_0, %c0_1, %c0_2] : memref<1x1x8x32xf32, #tpu.memory_space<vmem>>, vector<1x1x8x32xf32>
    %1 = vector.shape_cast %0 : vector<1x1x8x32xf32> to vector<8x32xf32>
    %c0_3 = arith.constant 0 : index
    %c0_4 = arith.constant 0 : index
    %c0_5 = arith.constant 0 : index
    %c0_6 = arith.constant 0 : index
    %2 = vector.load %arg4[%c0_3, %c0_4, %c0_5, %c0_6] : memref<1x1x8x32xf32, #tpu.memory_space<vmem>>, vector<1x1x8x32xf32>
    %3 = vector.shape_cast %2 : vector<1x1x8x32xf32> to vector<8x32xf32>
    %c0_7 = arith.constant 0 : index
    %c0_8 = arith.constant 0 : index
    %c0_9 = arith.constant 0 : index
    %c0_10 = arith.constant 0 : index
    %4 = vector.load %arg5[%c0_7, %c0_8, %c0_9, %c0_10] : memref<1x1x8x32xf32, #tpu.memory_space<vmem>>, vector<1x1x8x32xf32>
    %5 = vector.shape_cast %4 : vector<1x1x8x32xf32> to vector<8x32xf32>
    %cst = arith.constant dense<0.000000e+00> : vector<8x8xf32>
    %6 = tpu.matmul %1, %3, %cst {dimension_numbers = #tpu.dot_dimension_numbers<[1], [1], [0], [0], [0, 0, 1, 0], [], []>} : vector<8x32xf32>, vector<8x32xf32>, vector<8x8xf32> -> vector<8x8xf32>
    %c0_11 = arith.constant 0 : index
    %c0_12 = arith.constant 0 : index
    %c0_13 = arith.constant 0 : index
    %c0_14 = arith.constant 0 : index
    %7 = vector.load %arg6[%c0_11, %c0_12, %c0_13, %c0_14] : memref<1x1x8x8xi8, #tpu.memory_space<vmem>>, vector<1x1x8x8xi8>
    %8 = vector.shape_cast %7 : vector<1x1x8x8xi8> to vector<8x8xi8>
    %9 = arith.sitofp %8 : vector<8x8xi8> to vector<8x8xf32>
    %cst_15 = arith.constant 0.000000e+00 : f32
    %10 = vector.broadcast %cst_15 : f32 to vector<8x8xf32>
    %11 = arith.cmpf oeq, %9, %10 : vector<8x8xf32>
    %cst_16 = arith.constant -1.000000e+30 : f32
    %12 = vector.broadcast %cst_16 : f32 to vector<8x8xf32>
    %13 = arith.select %11, %12, %6 : vector<8x8xi1>, vector<8x8xf32>
    %cst_17 = arith.constant dense<0xFF800000> : vector<8xf32>
    %14 = vector.multi_reduction <maximumf>, %13, %cst_17 [1] : vector<8x8xf32> to vector<8xf32>
    %15 = vector.shape_cast %14 : vector<8xf32> to vector<8x1xf32>
    %16 = vector.broadcast %15 : vector<8x1xf32> to vector<8x8xf32>
    %17 = arith.subf %13, %16 : vector<8x8xf32>
    %18 = math.exp %17 : vector<8x8xf32>
    %cst_18 = arith.constant dense<0.000000e+00> : vector<8xf32>
    %19 = vector.multi_reduction <add>, %18, %cst_18 [1] : vector<8x8xf32> to vector<8xf32>
    %20 = vector.shape_cast %19 : vector<8xf32> to vector<8x1xf32>
    %21 = tpu.reciprocal %20 {approx = true} : vector<8x1xf32> -> vector<8x1xf32>
    %22 = vector.broadcast %21 : vector<8x1xf32> to vector<8x8xf32>
    %23 = arith.mulf %18, %22 : vector<8x8xf32>
    %c0_19 = arith.constant 0 : index
    %c0_20 = arith.constant 0 : index
    %c0_21 = arith.constant 0 : index
    %c0_22 = arith.constant 0 : index
    %24 = vector.load %arg8[%c0_19, %c0_20, %c0_21, %c0_22] : memref<1x1x8x8xf32, #tpu.memory_space<vmem>>, vector<1x1x8x8xf32>
    %25 = vector.shape_cast %24 : vector<1x1x8x8xf32> to vector<8x8xf32>
    %26 = vector.shape_cast %23 : vector<8x8xf32> to vector<1x1x8x8xf32>
    tpu.vector_store %arg8[%c0_19, %c0_20, %c0_21, %c0_22], %26 {strides = array<i32>} : memref<1x1x8x8xf32, #tpu.memory_space<vmem>>, vector<1x1x8x8xf32>,
    %cst_23 = arith.constant dense<0.000000e+00> : vector<8x32xf32>
    %27 = tpu.matmul %23, %5, %cst_23 {dimension_numbers = #tpu.dot_dimension_numbers<[1], [0], [0], [1], [0, 0, 1, 1], [], []>} : vector<8x8xf32>, vector<8x32xf32>, vector<8x32xf32> -> vector<8x32xf32>
    %c0_24 = arith.constant 0 : index
    %c0_25 = arith.constant 0 : index
    %c0_26 = arith.constant 0 : index
    %c0_27 = arith.constant 0 : index
    %28 = vector.load %arg7[%c0_24, %c0_25, %c0_26, %c0_27] : memref<1x1x8x32xf32, #tpu.memory_space<vmem>>, vector<1x1x8x32xf32>
    %29 = vector.shape_cast %28 : vector<1x1x8x32xf32> to vector<8x32xf32>
    %30 = vector.shape_cast %27 : vector<8x32xf32> to vector<1x1x8x32xf32>
    tpu.vector_store %arg7[%c0_24, %c0_25, %c0_26, %c0_27], %30 {strides = array<i32>} : memref<1x1x8x32xf32, #tpu.memory_space<vmem>>, vector<1x1x8x32xf32>,
    return
  }
  func.func @transform_0(%arg0: i32, %arg1: i32, %arg2: i32) -> (i32, i32, i32, i32) {
    %c0_i32 = arith.constant 0 : i32
    %c0_i32_0 = arith.constant 0 : i32
    return %arg0, %arg1, %arg2, %c0_i32 : i32, i32, i32, i32
  }
  func.func @transform_1(%arg0: i32, %arg1: i32, %arg2: i32) -> (i32, i32, i32, i32) {
    %c0_i32 = arith.constant 0 : i32
    %c0_i32_0 = arith.constant 0 : i32
    %c0_i32_1 = arith.constant 0 : i32
    return %arg0, %arg1, %c0_i32, %c0_i32_0 : i32, i32, i32, i32
  }
  func.func @transform_2(%arg0: i32, %arg1: i32, %arg2: i32) -> (i32, i32, i32, i32) {
    %c0_i32 = arith.constant 0 : i32
    %c0_i32_0 = arith.constant 0 : i32
    %c0_i32_1 = arith.constant 0 : i32
    return %arg0, %arg1, %c0_i32, %c0_i32_0 : i32, i32, i32, i32
  }
  func.func @transform_3(%arg0: i32, %arg1: i32, %arg2: i32) -> (i32, i32, i32, i32) {
    %c0_i32 = arith.constant 0 : i32
    %c0_i32_0 = arith.constant 0 : i32
    %c0_i32_1 = arith.constant 0 : i32
    %c0_i32_2 = arith.constant 0 : i32
    return %c0_i32, %c0_i32_0, %arg2, %c0_i32_1 : i32, i32, i32, i32
  }
  func.func @transform_4(%arg0: i32, %arg1: i32, %arg2: i32) -> (i32, i32, i32, i32) {
    %c0_i32 = arith.constant 0 : i32
    %c0_i32_0 = arith.constant 0 : i32
    return %arg0, %arg1, %arg2, %c0_i32 : i32, i32, i32, i32
  }
  func.func @transform_5(%arg0: i32, %arg1: i32, %arg2: i32) -> (i32, i32, i32, i32) {
    %c0_i32 = arith.constant 0 : i32
    %c0_i32_0 = arith.constant 0 : i32
    return %arg0, %arg1, %arg2, %c0_i32 : i32, i32, i32, i32
  }
}

</mosaic_0001>

<bundles_post_ra>
// kernel: tpu_custom_call.1
= control target key start
LH: loop header
LB: loop body
LE: loop exit
PB: predicated region body
PF: predicated region fallthrough
CT: control target
= control target key end

     0   :  { %s1441_s0 = inlined_call_operand.hbm [shape: f32[2,2,8,32], index: 0, kind: input, shape index: {}]   ;;  %s1442_s1 = inlined_call_operand.hbm [shape: f32[2,2,8,32], index: 1, kind: input, shape index: {}]   ;;  %s1443_s2 = inlined_call_operand.hbm [shape: f32[2,2,8,32], index: 2, kind: input, shape index: {}]   ;;  %s1444_s3 = inlined_call_operand.vmem [shape: s8[1,1,8,8], index: 3, kind: input, shape index: {}]   ;;  %s1445_s4 = inlined_call_operand.hbm [shape: f32[2,2,8,32], index: 4, kind: output, shape index: {0}]   ;;  %s1446_s5 = inlined_call_operand.hbm [shape: f32[2,2,8,8], index: 5, kind: output, shape index: {1}]  }
   0x1   :  { %1454 = sst [smem:[#allocation22_spill]] %s1442_s1 }
   0x2   :  { %11 = vsyncpa [#allocation3], 0 }
   0x3   :  { %13 = vsyncpa [#allocation3 + $0x1], 0 }
   0x4   :  { %14 = vsyncpa [#allocation6], 0 }
   0x5   :  { %16 = vsyncpa [#allocation6 + $0x1], 0 }
   0x6   :  { %17 = vsyncpa [#allocation4], 0 }
   0x7   :  { %19 = vsyncpa [#allocation4 + $0x1], 0 }
   0x8   :  { %20 = vsyncpa [#allocation10], 0 }
   0x9   :  { %22 = vsyncpa [#allocation10 + $0x1], 0  ;;  %s1175_s18 = smov 0   ;;  %s1177_s19 = smov 0  }
   0xa   :  { %s1179_s20 = smov 0   ;;  %s1181_s21 = smov 0  }
   0xb   :  { %s1183_s22 = smov 0   ;;  %s1185_s23 = smov 0  }
   0xc   :  { %s1187_s24 = smov 0   ;;  %s1189_s25 = smov 0  }
   0xd LB: > { %1455 = sst [smem:[#allocation15_spill]] %s1108_s18  ;;  %s1216_s26 = sadd.s32 4294967295, %s1136_s25   ;;  %s1136_s25 = sphi %s1189_s25, %s28_s25   ;;  %s1132_s24 = sphi %s1187_s24, %s1476_s24   ;;  %s1128_s23 = sphi %s1185_s23, %s1475_s23   ;;  %s1124_s22 = sphi %s1183_s22, %s1474_s22   ;;  %s1120_s21 = sphi %s1181_s21, %s1473_s21   ;;  %s1116_s20 = sphi %s1179_s20, %s1479_s20   ;;  %s1112_s19 = sphi %s1177_s19, %s1478_s19   ;;  %s1108_s18 = sphi %s1175_s18, %s1477_s18  }
   0xe   : > { %1456 = sst [smem:[#allocation16_spill]] %s1128_s23  ;;  %s779_s27 = sadd.s32 4294967294, %s1136_s25  }
   0xf   : > { %1457 = sst [smem:[#allocation17_spill]] %s1132_s24  ;;  %s43_s28 = sadd.s32 1, %s1128_s23 }
  0x10   : > { %s47_s29 = sadd.s32 1, %s1132_s24  ;;  %p45_p0 = scmp.ge.s32.totalorder %s43_s28, 2 }
  0x11   : > { %s58_s30 = sadd.s32 1, %s1116_s20  ;;  %p65_p1 = scmp.ne.s32.totalorder %s1116_s20, %s1112_s19 }
  0x12   : > { %p66_p2 = scmp.eq.s32.totalorder %s1136_s25, 0  ;;  %s1481_s28 = smov (%p45_p0, %s43_s28), 0 }
  0x13   : > { %1458 = sst [smem:[#allocation18_spill]] %s1481_s28  ;;  %s1483_s29 = smov (!%p45_p0, %s47_s29), %s1132_s24 }
  0x14   : > { %s52_s6 = ssub.s32 %s1128_s23, %s1481_s28  ;;  %p1230_p3 = por %p66_p2, %p65_p1 }
  0x15   : > { %p49_p4 = scmp.ge.s32.totalorder %s1483_s29, 2  ;;  %p71_p5 = scmp.ne.s32.totalorder %s1112_s19, %s1108_s18 }
  0x16   : > { %p72_p6 = scmp.eq.s32.totalorder %s1216_s26, 0  ;;  %p181_p7 = scmp.eq.s32.totalorder %s1216_s26, 3 }
  0x17   : > { %s1485_s29 = smov (%p49_p4, %s1483_s29), 0  ;;  %p187_p10 = scmp.eq.s32.totalorder %s779_s27, 3 }
  0x18   : > { %1460 = sst [smem:[#allocation19_spill]] %s1485_s29  ;;  %p1240_p8 = por %p72_p6, %p71_p5 }
  0x19   : > { %p1244_p9 = por %p181_p7, %p65_p1  ;;  %s51_s10 = ssub.s32 %s1132_s24, %s1485_s29 }
  0x1a   : > { %s53_s11 = sor.u32 %s52_s6, %s51_s10  ;;  %p1250_p12 = por %p187_p10, %p71_p5 }
  0x1b   : > { %p56_p11 = scmp.eq.s32.totalorder %s53_s11, 0  ;;  %p850_p13 = scmp.lt.s32.totalorder %s1136_s25, 4 }
  0x1c   : > { %s1463_s12 = scalar_select %p1250_p12, 1, 0 }
  0x1d   : > { %s1448_s13 = sand.u32 1, %s1116_s20   ;;  %s784_s16 = sshll.u32 %s1132_s24, 1 }
  0x1e   : > { %1464 = sst [smem:[#allocation20_spill]] %s1463_s12  ;;  %s1261_s15 = sshll.u32 %s1448_s13, 3 }
  0x1f   : > { %s1257_s14 = scalar_select %p56_p11, %s1116_s20, %s58_s30  }
  0x20   : > { %s254_s17 = sadd.s32 %s1128_s23, %s784_s16  ;;  %p1267_p0 = pnand %p850_p13, %p1230_p3 }
  0x21   : > { %1465 = sst [smem:[#allocation21_spill]] %s1257_s14  ;;  %s1271_s6 = sshll.u32 %s254_s17, 7 }
  0x22   : > { %s265_s10 = sand.u32 1, %s1136_s25   ;;  %s1467_s1 = sld [smem:[#allocation22_spill]] }
  0x23   : > { %s269_s13 = scalar_lea.vmem [#allocation5], %s1261_s15  ;;  %p792_p1 = scmp.ge.s32.totalorder %s1136_s25, 1 }
  0x24   : > { %s278_s28 = sshll.u32 %s269_s13, 4  ;;  %p303_p2 = scmp.lt.s32.totalorder %s1136_s25, 5  ;;  %s279_s28 = int_to_ptr.vmem [resolvable:$true] %s278_s28 }
  0x25   : > { %s1281_s7 = scalar_lea.sflag [#allocation6], %s265_s10  ;;  %p924_p3 = pneg %p1267_p0 }
  0x26   : > { %s935_s16 = scalar_lea.vmem %s279_s28, 128  ;;  %s1138_s17 = smov [#allocation5]  }
  0x27   : > { %p936_p4 = scmp.ne.s32.totalorder %s279_s28, %s935_s16  ;;  %s940_s24 = sshll.u32 %s1138_s17, 4  ;;  %s941_s24 = int_to_ptr.vmem [resolvable:$false] %s940_s24 }
  0x28   : > { %s276_s29 = scalar_lea.hbm %s1467_s1, %s1271_s6  ;;  %s942_s11 = scalar_lea.vmem %s941_s24, 256 }
  0x29   : > { %p938_p5 = pnand %p936_p4, %p924_p3  ;;  %p943_p7 = scmp.lt.s32.totalorder %s279_s28, %s941_s24 }
  0x2a   : > { %p944_p10 = scmp.lt.s32.totalorder %s942_s11, %s935_s16 }
  0x2b   : > { %p939_p6 = pneg %p938_p5 }
  0x2c   : > { %p945_p11 = por %p944_p10, %p943_p7 }
  0x2e   : > { %p946_p13 = pnand %p945_p11, %p939_p6 }
  0x30   : > { %949 = shalt.err (!%p946_p13)
}
  0x31   : > { %839 = dma.hbm_to_vmem [thread:$0]  (!%p1267_p0), %s276_s29, 128, %s279_s28, %s1281_s7  }
  0x32   : > { %p1295_p4 = pnand %p792_p1, %p303_p2  ;;  %s256_s30 = scalar_lea.hbm %s1441_s0, %s1271_s6 }
  0x33   : > { %s248_s16 = scalar_lea.vmem [#allocation2], %s1261_s15  ;;  %s296_s23 = scalar_lea.hbm %s1443_s2, %s1271_s6 }
  0x34   : > { %s258_s17 = sshll.u32 %s248_s16, 4  ;;  %s1469_s14 = sand.u32 1, %s1116_s20   ;;  %s259_s17 = int_to_ptr.vmem [resolvable:$true] %s258_s17 }
  0x35   : > { %s245_s12 = scalar_lea.sflag [#allocation3], %s1469_s14  ;;  %s963_s28 = scalar_lea.vmem %s259_s17, 128 }
  0x36   : > { %p964_p5 = scmp.ne.s32.totalorder %s259_s17, %s963_s28  ;;  %s1139_s29 = smov [#allocation2]  }
  0x37   : > { %s968_s18 = sshll.u32 %s1139_s29, 4  ;;  %s969_s18 = int_to_ptr.vmem [resolvable:$false] %s968_s18 }
  0x38   : > { %p966_p1 = pnand %p964_p5, %p924_p3  ;;  %s970_s24 = scalar_lea.vmem %s969_s18, 256 }
  0x39   : > { %p971_p6 = scmp.lt.s32.totalorder %s259_s17, %s969_s18  ;;  %p972_p7 = scmp.lt.s32.totalorder %s970_s24, %s963_s28 }
  0x3a   : > { %p967_p2 = pneg %p966_p1 }
  0x3b   : > { %p973_p10 = por %p972_p7, %p971_p6 }
  0x3d   : > { %p974_p11 = pnand %p973_p10, %p967_p2 }
  0x3f   : > { %977 = shalt.err (!%p974_p11)
}
  0x40   : > { %836 = dma.hbm_to_vmem [thread:$0]  (!%p1267_p0), %s256_s30, 128, %s259_s17, %s245_s12  }
  0x41   : > { %s289_s1 = scalar_lea.vmem [#allocation7], %s1261_s15  ;;  %s1140_s16 = smov [#allocation7]  }
  0x42   : > { %s298_s14 = sshll.u32 %s289_s1, 4  ;;  %s996_s18 = sshll.u32 %s1140_s16, 4  ;;  %s299_s14 = int_to_ptr.vmem [resolvable:$true] %s298_s14  ;;  %s997_s18 = int_to_ptr.vmem [resolvable:$false] %s996_s18 }
  0x43   : > { %s991_s10 = scalar_lea.vmem %s299_s14, 128  ;;  %s998_s11 = scalar_lea.vmem %s997_s18, 256 }
  0x44   : > { %p992_p13 = scmp.ne.s32.totalorder %s299_s14, %s991_s10  ;;  %p999_p2 = scmp.lt.s32.totalorder %s299_s14, %s997_s18 }
  0x45   : > { %p1000_p6 = scmp.lt.s32.totalorder %s998_s11, %s991_s10 }
  0x46   : > { %p994_p5 = pnand %p992_p13, %p924_p3 }
  0x47   : > { %p1001_p7 = por %p1000_p6, %p999_p2 }
  0x48   : > { %p995_p1 = pneg %p994_p5 }
  0x4a   : > { %p1002_p10 = pnand %p1001_p7, %p995_p1 }
  0x4c   : > { %1005 = shalt.err (!%p1002_p10)
}
  0x4d   : > { %842 = dma.hbm_to_vmem [thread:$0]  (!%p1267_p0), %s296_s23, 128, %s299_s14, %s1281_s7  }
  0x4e   : > { %307 = sbr.rel (%p1295_p4) target bundleno = 806 (0x326), region = 36  ;;  %s1330_s30 = sand.u32 (!%p1295_p4), 1, %s1112_s19  }
  0x4f   : > { %s1333_s17 = sshll.u32 (!%p1295_p4), %s1330_s30, 3  ;;  %s310_s27 = scalar_lea.sflag (!%p1295_p4), [#allocation3], %s1330_s30 }
  0x50   : > { %s313_s28 = scalar_lea.vmem (!%p1295_p4), [#allocation2], %s1333_s17 }
  0x53   : > { %1091 = dma.done.wait (%p1240_p8), %s310_s27, 128  }
  0x54   : > { %1093 = vsyncadd (%p1240_p8), %s310_s27, 4294967168  ;;  %s318_s23 = sand.u32 1, %s1216_s26   ;;  %s322_s7 = scalar_lea.vmem [#allocation5], %s1333_s17 }
  0x55   : > { %s319_s6 = scalar_lea.sflag [#allocation6], %s318_s23 }
  0x56   : > { %1095 = dma.done.wait (%p1240_p8), %s319_s6, 256  }
  0x57   : > { %1097 = vsyncadd (%p1240_p8), %s319_s6, 4294967040  ;;  %v1141_v0 = vmov 0.0   ;;  %vm1142_vm0 = vmmov 0   ;;  %vm384_vm1 = vcmask 261120   ;;  %v382_v1 = vld [vmem:[%s322_s7] sm:$0xff]  ;;  %v381_v2 = vld [vmem:[%s313_s28] sm:$0xff] }
  0x58   : > { %813 = vmatprep.subr.mxu0 %v1141_v0  ;;  %815 = vmatprep.mubr.msk.f32.mxu0 %vm1142_vm0, %v1141_v0  ;;  %v461_v3 = vld [vmem:[%s1444_s3] sm:$0x3]  ;;  %vm466_vm3 = vcmask 64512   ;;  %s331_s8 = scalar_lea.vmem [#allocation7], %s1333_s17  ;;  %s376_s29 = scalar_lea.vmem [#allocation9], %s1333_s17 }
  0x59   : > { %818 = vmatprep.subr.mxu1 %v1141_v0  ;;  %820 = vmatprep.mubr.msk.f32.mxu1 %vm1142_vm0, %v1141_v0  ;;  %v462_v4 = vunpack.c.0.s8 %v461_v3  ;;  %v383_v15 = vld [vmem:[%s331_s8] sm:$0xff]  ;;  %s803_s24 = sshll.u32 %s1124_s22, 1  ;;  %s591_s11 = sshll.u32 %s376_s29, 4  ;;  %s592_s11 = int_to_ptr.vmem [resolvable:$true] %s591_s11 }
  0x5a   : > { %814 = vmatpush3.xpose.msk.msra.mxu0 %vm384_vm1, %v382_v1  ;;  %819 = vmatpush3.msra.mxu1 %v383_v15  ;;  %s1360_s1 = sadd.s32 %s1120_s21, %s803_s24  ;;  %s559_s12 = scalar_lea.sflag [#allocation10], %s1330_s30 }
  0x5b   : > { %v463_v5 = vcvt.s32.f32 %v462_v4  ;;  %s804_s14 = sshll.u32 %s1360_s1, 7  ;;  %s1006_s15 = scalar_lea.vmem %s592_s11, 128 }
  0x5c   : > { %s589_s18 = scalar_lea.hbm %s1446_s5, %s804_s14  ;;  %p1007_p8 = scmp.ne.s32.totalorder %s592_s11, %s1006_s15 }
  0x5d   : > { %816 = vmatmul.mubr.msk.f32.vlgmr.msra.gmra.mxu0 %vm384_vm1, %v381_v2  ;;  %vm464_vm2 = vcmp.eq.f32.partialorder %v463_v5, 0.0  ;;  %s1143_s27 = smov [#allocation9]  }
  0x5e   : > { %p1008_p0 = pnand %p1007_p8, %p1244_p9  ;;  %s1010_s22 = sshll.u32 %s1143_s27, 4  ;;  %s1011_s22 = int_to_ptr.vmem [resolvable:$false] %s1010_s22 }
  0x5f   : > { %s1012_s21 = scalar_lea.vmem %s1011_s22, 256  ;;  %p1013_p4 = scmp.lt.s32.totalorder %s592_s11, %s1011_s22 }
  0x60   : > { %p1009_p3 = pneg %p1008_p0  ;;  %p1014_p11 = scmp.lt.s32.totalorder %s1012_s21, %s1006_s15 }
  0x62   : > { %p1015_p13 = por %p1014_p11, %p1013_p4 }
  0x64   : > { %p1016_p5 = pnand %p1015_p13, %p1009_p3 }
 0x11d   : > { %v457_v6 = vpop.f32.mrf.mxu0 }
 0x11e   : > { %v465_v7 = vsel %vm464_vm2, -1e+30, %v457_v6 }
 0x11f   : > { %v817_v8 = vpop.f32.mrf.mxu0  ;;  %v467_v9 = vsel %vm466_vm3, %v465_v7, -inf }
 0x120   : > { %468 = vmax.xlane.f32.xlu0 %v467_v9 }
 0x1a9   : > { %v469_v10 = vpop.xlane.xlu0 %468 }
 0x1aa   : > { %v470_v11 = vsub.f32 %v465_v7, %v469_v10 }
 0x1ac   : > { %v471_v12 = vmul.f32 1.442695, %v470_v11 }
 0x1ae   : > { %918 = vpow2.f32 %v471_v12 }
 0x1bb   : > { %v919_v13 = vpop.eup %918 }
 0x1bc   : > { %v473_v14 = vsel %vm466_vm3, %v919_v13, 0.0 }
 0x1bd   : > { %474 = vadd.xlane.f32.xlu0 %v473_v14 }
 0x246   : > { %v475_v16 = vpop.xlane.xlu0 %474 }
 0x247   : > { %920 = vrcp.f32 %v475_v16 }
 0x254   : > { %v921_v17 = vpop.eup %920 }
 0x255   : > { %v477_v18 = vmul.f32 %v921_v17, %v919_v13 }
 0x257   : > { %821 = vmatmul.mubr.msk.f32.vlgmr.msra.gmra.mxu1 %vm466_vm3, %v477_v18  ;;  %478 = vst.msk [vmem:[%s376_s29] sm:$0xff] %vm466_vm3, %v477_v18 }
 0x258   : > { %1019 = shalt.err (!%p1016_p5)
}
 0x259   : > { %s1020_s28 = scalar_lea.hbm %s589_s18, 128  ;;  %s1024_s7 = scalar_lea.hbm %s1446_s5, 512 }
 0x25a   : > { %p1021_p1 = scmp.ne.s32.totalorder %s589_s18, %s1020_s28  ;;  %p1025_p7 = scmp.lt.s32.totalorder %s589_s18, %s1446_s5 }
 0x25b   : > { %p1026_p10 = scmp.lt.s32.totalorder %s1024_s7, %s1020_s28 }
 0x25c   : > { %p1022_p2 = pnand %p1021_p1, %p1244_p9 }
 0x25d   : > { %p1027_p8 = por %p1026_p10, %p1025_p7 }
 0x25e   : > { %p1023_p6 = pneg %p1022_p2 }
 0x260   : > { %p1028_p0 = pnand %p1027_p8, %p1023_p6 }
 0x262   : > { %1031 = shalt.err (!%p1028_p0)
}
 0x263   : > { %830 = dma.vmem_to_hbm [thread:$0]  (%p1244_p9), %s592_s11, 128, %s589_s18, %s559_s12  }
 0x264   : > { %s369_s8 = scalar_lea.vmem [#allocation8], %s1333_s17  ;;  %s1387_s16 = scalar_lea.hbm %s1445_s4, %s804_s14 }
 0x265   : > { %s575_s29 = sshll.u32 %s369_s8, 4  ;;  %s554_s15 = scalar_lea.sflag [#allocation4], %s1330_s30  ;;  %s1389_s29 = int_to_ptr.vmem [resolvable:$true] %s575_s29 }
 0x266   : > { %s1032_s27 = scalar_lea.vmem %s1389_s29, 128  ;;  %s1144_s17 = smov [#allocation8]  }
 0x267   : > { %p1033_p3 = scmp.ne.s32.totalorder %s1389_s29, %s1032_s27  ;;  %s1036_s1 = sshll.u32 %s1144_s17, 4  ;;  %s1037_s1 = int_to_ptr.vmem [resolvable:$false] %s1036_s1 }
 0x268   : > { %s1038_s14 = scalar_lea.vmem %s1037_s1, 256  ;;  %p1039_p13 = scmp.lt.s32.totalorder %s1389_s29, %s1037_s1 }
 0x269   : > { %p1034_p4 = pnand %p1033_p3, %p1244_p9  ;;  %p1040_p5 = scmp.lt.s32.totalorder %s1038_s14, %s1032_s27 }
 0x26b   : > { %p1035_p11 = pneg %p1034_p4  ;;  %p1041_p1 = por %p1040_p5, %p1039_p13 }
 0x26d   : > { %p1042_p2 = pnand %p1041_p1, %p1035_p11 }
 0x317   : > { %v548_v19 = vpop.f32.mrf.mxu1 }
 0x318   : > { %552 = vst.msk [vmem:[%s369_s8] sm:$0xff] %vm384_vm1, %v548_v19 }
 0x319   : > { %v822_v20 = vpop.f32.mrf.mxu1 }
 0x31a   : > { %1045 = shalt.err (!%p1042_p2)
}
 0x31b   : > { %s1046_s18 = scalar_lea.hbm %s1387_s16, 128  ;;  %s1050_s12 = scalar_lea.hbm %s1445_s4, 512 }
 0x31c   : > { %p1047_p6 = scmp.ne.s32.totalorder %s1387_s16, %s1046_s18  ;;  %p1051_p8 = scmp.lt.s32.totalorder %s1387_s16, %s1445_s4 }
 0x31d   : > { %p1052_p0 = scmp.lt.s32.totalorder %s1050_s12, %s1046_s18 }
 0x31e   : > { %p1048_p7 = pnand %p1047_p6, %p1244_p9 }
 0x31f   : > { %p1053_p3 = por %p1052_p0, %p1051_p8 }
 0x320   : > { %p1049_p10 = pneg %p1048_p7 }
 0x322   : > { %p1054_p4 = pnand %p1053_p3, %p1049_p10 }
 0x324   : > { %1057 = shalt.err (!%p1054_p4)
}
 0x325   : > { %829 = dma.vmem_to_hbm [thread:$0]  (%p1244_p9), %s1389_s29, 128, %s1387_s16, %s554_s15  }
 0x326 PF: > { %s1470_s28 = sld [smem:[#allocation15_spill]]  ;;  %p851_p11 = scmp.ge.s32.totalorder %s1136_s25, 2 }
 0x328   : > { %p844_p13 = pnand %p851_p11, %p1250_p12 }
 0x32a   : > { %p845_p5 = pneg %p844_p13 }
 0x32c   : > { %s603_s6 = sand.u32 1, %s1470_s28  }
 0x32d   : > { %s604_s7 = scalar_lea.sflag [#allocation4], %s603_s6 }
 0x32e   : > { %1099 = dma.done.wait (%p845_p5), %s604_s7, 128  }
 0x32f   : > { %1101 = vsyncadd (%p845_p5), %s604_s7, 4294967168  ;;  %s613_s26 = scalar_lea.sflag [#allocation10], %s603_s6 }
 0x330   : > { %1103 = dma.done.wait (%p845_p5), %s613_s26, 128  }
 0x331   : > { %1105 = vsyncadd (%p845_p5), %s613_s26, 4294967168  ;;  %s28_s25 = sadd.s32 1, %s1136_s25   ;;  %s1472_s9 = sld [smem:[#allocation21_spill]] }
 0x332   : > { %p25_p1 = scmp.ge.s32.totalorder %s28_s25, 6   ;;  %s1473_s21 = sld [smem:[#allocation16_spill]] }
 0x333   : > { %s1474_s22 = sld [smem:[#allocation17_spill]]  ;;  %s1477_s18 = smov %s1112_s19 }
 0x334   : > { %s1475_s23 = sld [smem:[#allocation18_spill]]  ;;  %s1478_s19 = smov %s1116_s20 }
 0x335   : > { %s1476_s24 = sld [smem:[#allocation19_spill]]  ;;  %27 = sbr.rel (!%p25_p1) target bundleno = 13 (0xd), region = 125 }
 0x337   : > { %s1479_s20 = smov %s1472_s9 }
 0x33a   :  { %618 = vsyncpa [#allocation3], 1 }
 0x33b   :  { %620 = vsyncpa [#allocation3 + $0x1], 1 }
 0x33c   :  { %621 = vsyncpa [#allocation6], 1 }
 0x33d   :  { %623 = vsyncpa [#allocation6 + $0x1], 1 }
 0x33e   :  { %624 = vsyncpa [#allocation4], 1 }
 0x33f   :  { %626 = vsyncpa [#allocation4 + $0x1], 1 }
 0x340   :  { %627 = vsyncpa [#allocation10], 1 }
 0x341   :  { %629 = vsyncpa [#allocation10 + $0x1], 1 }

</bundles_post_ra>
